<compile_context>
chip_gen: v7x
topology: tpu7x:2x2x1
jax: 0.10.0
libtpu: 0.0.40
codegen_flags: <defaults>
</compile_context>

<pallas_src>
import functools

import jax
import jax.numpy as jnp
from jax.experimental import pallas as pl
from jax.experimental.pallas import tpu as pltpu


def _round_up(v, m):
    return ((v + m - 1) // m) * m


def _linear_relu_kernel(x_ref, w_ref, b_ref, o_ref, *, compute_dtype):
    # Single-K-tile fast path: no accumulator scratch, fused epilogue.
    # x_ref: (TM, TK) f32; w_ref: (TK, TN) bf16 (pre-transposed); b_ref: (1, TN) f32.
    x = x_ref[...].astype(compute_dtype)                     # VPU cast, hidden under MXU
    acc = jnp.dot(x, w_ref[...], preferred_element_type=jnp.float32)
    o_ref[...] = jnp.maximum(acc + b_ref[...], 0.0).astype(o_ref.dtype)


def _linear_relu_kernel_multi_k(x_ref, w_ref, b_ref, o_ref, acc_ref, *, compute_dtype):
    # Fallback for genuinely huge K (Kp // tk > 1). Reduction axis is grid axis 2.
    k = pl.program_id(2)
    x = x_ref[...].astype(compute_dtype)
    part = jnp.dot(x, w_ref[...], preferred_element_type=jnp.float32)

    @pl.when(k == 0)
    def _():
        acc_ref[...] = part                                  # write, not zero-init + add

    @pl.when(k > 0)
    def _():
        acc_ref[...] += part

    @pl.when(k == pl.num_programs(2) - 1)
    def _():
        o_ref[...] = jnp.maximum(acc_ref[...] + b_ref[...], 0.0).astype(o_ref.dtype)


def prepare_top_model_params(weight, bias, *, tn=512, tk=2048,
                             compute_dtype=jnp.bfloat16):
    """One-time parameter prep (call at setup, NOT per forward call).

    weight: (H, K) f32, nn.Linear layout.  bias: (H,) f32.
    Returns (w_kh, b2): weight transposed to (Kp, Hp) bf16 and bias as (1, Hp) f32,
    both zero-padded to tile multiples. Use the same tn/tk in top_model_forward.
    """
    H, K = weight.shape
    assert bias.shape == (H,)
    tn_eff = _round_up(min(tn, _round_up(H, 128)), 128)
    tk_eff = _round_up(min(tk, _round_up(K, 128)), 128)
    Hp = _round_up(H, tn_eff)
    Kp = _round_up(K, tk_eff)
    # (K, H) layout so the in-kernel contraction is a plain x @ w (no XLU transpose).
    w_kh = weight.T.astype(compute_dtype)
    if (Kp, Hp) != (K, H):
        w_kh = jnp.pad(w_kh, ((0, Kp - K), (0, Hp - H)))
    b2 = bias.astype(jnp.float32).reshape(1, H)
    if Hp != H:
        b2 = jnp.pad(b2, ((0, 0), (0, Hp - H)))
    return w_kh, b2


def top_model_forward(x, w_kh, b2, out_features=None, *, tm=256, tn=512, tk=2048,
                      compute_dtype=jnp.bfloat16, out_dtype=None):
    """relu(x @ weight.T + bias) with pre-prepared params (see prepare_top_model_params).

    x:    (B, K)   float32 (or bf16) — cast to compute_dtype inside the kernel.
    w_kh: (Kp, Hp) compute_dtype — weight.T, padded.
    b2:   (1, Hp)  float32 — bias, padded.
    """
    B, K = x.shape
    Kp, Hp = w_kh.shape
    assert b2.shape == (1, Hp) and K <= Kp
    H = Hp if out_features is None else out_features
    out_dtype = x.dtype if out_dtype is None else out_dtype
    out_itemsize = jnp.dtype(out_dtype).itemsize

    # Effective, lane-dense tiles. B rounded to 16 so bf16 MXU feeds aren't
    # half-packed 8-row tiles (v6e/v7x note).
    tm_eff = _round_up(min(tm, _round_up(B, 16)), 8)
    tn_eff = _round_up(min(tn, Hp), 128)
    tk_eff = _round_up(min(tk, Kp), 128)
    assert Hp % tn_eff == 0 and Kp % tk_eff == 0, \
        "use the same tn/tk in prepare_top_model_params and top_model_forward"

    Bp = _round_up(B, tm_eff)
    # Only pad where required: K (reduction correctness — padded weight rows are
    # zero, but garbage x columns could be NaN) and B (tile divisibility).
    if (Bp, Kp) != (B, K):
        x = jnp.pad(x, ((0, Bp - B), (0, Kp - K)))

    ni = Bp // tm_eff        # batch tiles
    nj = Hp // tn_eff        # output-feature tiles
    nk = Kp // tk_eff        # reduction tiles (1 for typical K with tk=2048)

    # Streamed-operand HBM traffic: x re-read nj times if streamed, W re-read ni
    # times if streamed; the resident operand is read once (when nk == 1).
    x_stream_bytes = Bp * Kp * x.dtype.itemsize * nj
    w_stream_bytes = Kp * Hp * w_kh.dtype.itemsize * ni
    stream_x = x_stream_bytes <= w_stream_bytes

    if nk == 1:
        if stream_x:
            # W tile resident per outer j; x streamed over the inner batch sweep.
            grid = (nj, ni)
            x_map = lambda j, i: (i, 0)
            w_map = lambda j, i: (0, j)
            b_map = lambda j, i: (0, j)
            o_map = lambda j, i: (i, j)
        else:
            # x tile resident per outer i; W streamed over the inner feature sweep.
            grid = (ni, nj)
            x_map = lambda i, j: (i, 0)
            w_map = lambda i, j: (0, j)
            b_map = lambda i, j: (0, j)
            o_map = lambda i, j: (i, j)
        kernel = functools.partial(_linear_relu_kernel, compute_dtype=compute_dtype)
        scratch_shapes = []
        dim_sem = ("parallel", "parallel")
        in_bytes = (min(x_stream_bytes, w_stream_bytes)
                    + (Kp * Hp * w_kh.dtype.itemsize if stream_x
                       else Bp * Kp * x.dtype.itemsize))
    else:
        grid = (nj, ni, nk)
        x_map = lambda j, i, k: (i, k)
        w_map = lambda j, i, k: (k, j)
        b_map = lambda j, i, k: (0, j)
        o_map = lambda j, i, k: (i, j)
        kernel = functools.partial(_linear_relu_kernel_multi_k,
                                   compute_dtype=compute_dtype)
        scratch_shapes = [pltpu.VMEM((tm_eff, tn_eff), jnp.float32)]
        dim_sem = ("parallel", "parallel", "arbitrary")
        in_bytes = x_stream_bytes + w_stream_bytes

    cost = pl.CostEstimate(
        flops=2 * B * K * H,
        transcendentals=0,
        bytes_accessed=int(in_bytes + Hp * 4 + Bp * Hp * out_itemsize))

    # Double-buffered inputs/output (+ acc if multi-k). Raise scoped-VMEM ceiling
    # only when large tiles need it (v5e default 16 MiB, v6e/v7x 32 MiB); keep
    # tiles modest on v7x (64 MiB physical per core).
    vmem_est = (2 * tm_eff * tk_eff * x.dtype.itemsize
                + 2 * tk_eff * tn_eff * w_kh.dtype.itemsize
                + 2 * tn_eff * 4
                + 2 * tm_eff * tn_eff * out_itemsize
                + (tm_eff * tn_eff * 4 if nk > 1 else 0))
    cp_kwargs = dict(dimension_semantics=dim_sem)
    if vmem_est > 12 * 1024 * 1024:
        cp_kwargs["vmem_limit_bytes"] = int(min(2 * vmem_est, 96 * 1024 * 1024))

    out = pl.pallas_call(
        kernel,
        out_shape=jax.ShapeDtypeStruct((Bp, Hp), out_dtype),
        grid_spec=pltpu.PrefetchScalarGridSpec(
            num_scalar_prefetch=0,
            grid=grid,
            in_specs=[
                pl.BlockSpec((tm_eff, tk_eff), x_map),   # x  (f32, cast in-kernel)
                pl.BlockSpec((tk_eff, tn_eff), w_map),   # W^T (bf16, pre-prepared)
                pl.BlockSpec((1, tn_eff), b_map),        # bias (f32)
            ],
            out_specs=pl.BlockSpec((tm_eff, tn_eff), o_map),
            scratch_shapes=scratch_shapes,
        ),
        compiler_params=pltpu.CompilerParams(**cp_kwargs),
        cost_estimate=cost,
    )(x, w_kh, b2)

    if (Bp, Hp) != (B, H):
        out = out[:B, :H]
    return out


if __name__ == "__main__":
    # TopModel(input_dim=32, top_hidden_dim=64) on a batch of 8.
    # (Tiny shapes pad to one lane-dense tile; the kernel pays off at MXU-scale
    #  dims — for literal shapes this small, plain jnp or fusing into the
    #  surrounding kernel is the right production choice.)
    input_dim, top_hidden_dim, batch = 32, 64, 8

    key = jax.random.PRNGKey(0)
    kx, kw, kb = jax.random.split(key, 3)

    x = jax.random.normal(kx, (batch, input_dim), dtype=jnp.float32)
    bound = 1.0 / (input_dim ** 0.5)
    weight = jax.random.uniform(kw, (top_hidden_dim, input_dim),
                                minval=-bound, maxval=bound, dtype=jnp.float32)
    bias = jax.random.uniform(kb, (top_hidden_dim,),
                              minval=-bound, maxval=bound, dtype=jnp.float32)

    # One-time parameter prep (would normally live at module-setup / jit-const time).
    w_prep, b_prep = prepare_top_model_params(weight, bias)

    out = jax.block_until_ready(
        top_model_forward(x, w_prep, b_prep, out_features=top_hidden_dim))
    assert out.shape == (batch, top_hidden_dim)

    # Reference 1: same bf16-in / f32-accumulate datapath (tight tolerance).
    ref_bf16 = jnp.maximum(
        jnp.dot(x.astype(jnp.bfloat16), weight.astype(jnp.bfloat16).T,
                preferred_element_type=jnp.float32) + bias, 0.0)
    # Reference 2: full f32 math (loose tolerance covers bf16 input rounding).
    ref_f32 = jnp.maximum(x @ weight.T + bias, 0.0)

    assert jnp.allclose(out, ref_bf16, atol=1e-4, rtol=1e-4)
    assert jnp.allclose(out, ref_f32, atol=5e-2, rtol=5e-2)

    print("KERNEL_OK")
</pallas_src>

<mosaic_0001>
module attributes {stable_mosaic.version = 11 : i64} {
  func.func @_linear_relu_kernel(%arg0: i32, %arg1: i32, %arg2: memref<16x128xf32, #tpu.memory_space<vmem>>, %arg3: memref<128x128xbf16, #tpu.memory_space<vmem>>, %arg4: memref<1x128xf32, #tpu.memory_space<vmem>>, %arg5: memref<16x128xf32, #tpu.memory_space<vmem>>) attributes {dimension_semantics = [#tpu.dimension_semantics<parallel>, #tpu.dimension_semantics<parallel>], iteration_bounds = array<i64: 1, 1>, scalar_prefetch = 0 : i64, scratch_operands = 0 : i64, tpu.core_type = #tpu.core_type<tc>, window_params = [{transform_indices = @transform_0, window_bounds = array<i64: 16, 128>}, {transform_indices = @transform_1, window_bounds = array<i64: 128, 128>}, {transform_indices = @transform_2, window_bounds = array<i64: 1, 128>}, {transform_indices = @transform_3, window_bounds = array<i64: 16, 128>}]} {
    %c0 = arith.constant 0 : index
    %c0_0 = arith.constant 0 : index
    %0 = vector.load %arg2[%c0, %c0_0] : memref<16x128xf32, #tpu.memory_space<vmem>>, vector<16x128xf32>
    %1 = arith.truncf %0 : vector<16x128xf32> to vector<16x128xbf16>
    %c0_1 = arith.constant 0 : index
    %c0_2 = arith.constant 0 : index
    %2 = vector.load %arg3[%c0_1, %c0_2] : memref<128x128xbf16, #tpu.memory_space<vmem>>, vector<128x128xbf16>
    %cst = arith.constant dense<0.000000e+00> : vector<16x128xf32>
    %3 = tpu.matmul %1, %2, %cst {dimension_numbers = #tpu.dot_dimension_numbers<[1], [0], [0], [1], [0, 0, 1, 1], [], []>} : vector<16x128xbf16>, vector<128x128xbf16>, vector<16x128xf32> -> vector<16x128xf32>
    %c0_3 = arith.constant 0 : index
    %c0_4 = arith.constant 0 : index
    %4 = vector.load %arg4[%c0_3, %c0_4] : memref<1x128xf32, #tpu.memory_space<vmem>>, vector<1x128xf32>
    %5 = vector.broadcast %4 : vector<1x128xf32> to vector<16x128xf32>
    %6 = arith.addf %3, %5 : vector<16x128xf32>
    %cst_5 = arith.constant 0.000000e+00 : f32
    %7 = vector.broadcast %cst_5 : f32 to vector<16x128xf32>
    %8 = arith.maximumf %6, %7 : vector<16x128xf32>
    %c0_6 = arith.constant 0 : index
    %c0_7 = arith.constant 0 : index
    %9 = vector.load %arg5[%c0_6, %c0_7] : memref<16x128xf32, #tpu.memory_space<vmem>>, vector<16x128xf32>
    tpu.vector_store %arg5[%c0_6, %c0_7], %8 {strides = array<i32>} : memref<16x128xf32, #tpu.memory_space<vmem>>, vector<16x128xf32>,
    return
  }
  func.func @transform_0(%arg0: i32, %arg1: i32) -> (i32, i32) {
    %c0_i32 = arith.constant 0 : i32
    %c0_i32_0 = arith.constant 0 : i32
    return %arg1, %c0_i32 : i32, i32
  }
  func.func @transform_1(%arg0: i32, %arg1: i32) -> (i32, i32) {
    %c0_i32 = arith.constant 0 : i32
    %c0_i32_0 = arith.constant 0 : i32
    return %c0_i32, %arg0 : i32, i32
  }
  func.func @transform_2(%arg0: i32, %arg1: i32) -> (i32, i32) {
    %c0_i32 = arith.constant 0 : i32
    %c0_i32_0 = arith.constant 0 : i32
    return %c0_i32, %arg0 : i32, i32
  }
  func.func @transform_3(%arg0: i32, %arg1: i32) -> (i32, i32) {
    %c0_i32 = arith.constant 0 : i32
    return %arg1, %arg0 : i32, i32
  }
}

</mosaic_0001>

<bundles_post_ra>
// kernel: tpu_custom_call.1
= control target key start
LH: loop header
LB: loop body
LE: loop exit
PB: predicated region body
PF: predicated region fallthrough
CT: control target
= control target key end

     0   :  { %8 = vsyncpa [#allocation3], 0  ;;  %s382_s0 = inlined_call_operand.hbm [shape: f32[16,128], index: 0, kind: input, shape index: {}]   ;;  %s383_s1 = inlined_call_operand.hbm [shape: bf16[128,128], index: 1, kind: input, shape index: {}]   ;;  %s384_s2 = inlined_call_operand.vmem [shape: f32[1,128], index: 2, kind: input, shape index: {}]   ;;  %s385_s3 = inlined_call_operand.hbm [shape: f32[16,128], index: 3, kind: output, shape index: {}]  }
   0x1   :  { %9 = vsyncpa [#allocation6], 0 }
   0x2   :  { %10 = vsyncpa [#allocation4], 0  ;;  %s308_s12 = smov [#allocation2]   ;;  %s236_s16 = scalar_lea.hbm %s382_s0, 256 }
   0x3   :  { %s16_s13 = sshll.u32 %s308_s12, 4  ;;  %p237_p0 = scmp.ne.s32.totalorder %s382_s0, %s236_s16  ;;  %s17_s13 = int_to_ptr.vmem [resolvable:$true] %s16_s13 }
   0x4   :  { %p240_p1 = scmp.lt.u32.totalorder %s236_s16, %s382_s0 }
   0x6   :  { %p242_p2 = pnand %p240_p1, %p237_p0 }
   0x8   :  { %245 = shalt.err (!%p242_p2)
}
   0x9   :  { %s246_s21 = scalar_lea.vmem %s17_s13, 256  ;;  %p251_p4 = scmp.lt.s32.totalorder %s17_s13, %s17_s13 }
   0xa   :  { %p247_p3 = scmp.ne.s32.totalorder %s17_s13, %s246_s21  ;;  %p252_p5 = scmp.lt.s32.totalorder %s246_s21, %s246_s21 }
   0xc   :  { %p253_p6 = por %p252_p5, %p251_p4 }
   0xe   :  { %p254_p7 = pnand %p253_p6, %p247_p3 }
  0x10   :  { %257 = shalt.err (!%p254_p7)
}
  0x11   :  { %s309_s22 = smov 128   ;;  %s310_s23 = smov 8  }
  0x12   :  { %22 = dma.hbm_to_vmem [thread:$0]  %s382_s0, 256, %s17_s13, [#allocation3], %s309_s22, %s309_s22, %s310_s23  }
  0x13   :  { %s311_s26 = smov [#allocation5]   ;;  %s258_s30 = scalar_lea.hbm %s383_s1, 1024 }
  0x14   :  { %s28_s27 = sshll.u32 %s311_s26, 4  ;;  %p259_p8 = scmp.ne.s32.totalorder %s383_s1, %s258_s30  ;;  %s29_s27 = int_to_ptr.vmem [resolvable:$true] %s28_s27 }
  0x15   :  { %p262_p9 = scmp.lt.u32.totalorder %s258_s30, %s383_s1 }
  0x17   :  { %p264_p10 = pnand %p262_p9, %p259_p8 }
  0x19   :  { %267 = shalt.err (!%p264_p10)
}
  0x1a   :  { %s268_s8 = scalar_lea.vmem %s29_s27, 1024  ;;  %p273_p12 = scmp.lt.s32.totalorder %s29_s27, %s29_s27 }
  0x1b   :  { %p269_p11 = scmp.ne.s32.totalorder %s29_s27, %s268_s8  ;;  %p274_p13 = scmp.lt.s32.totalorder %s268_s8, %s268_s8 }
  0x1d   :  { %p275_p0 = por %p274_p13, %p273_p12 }
  0x1f   :  { %p276_p1 = pnand %p275_p0, %p269_p11 }
  0x21   :  { %279 = shalt.err (!%p276_p1)
}
  0x22   :  { %s312_s0 = smov 64   ;;  %s313_s9 = smov 4  }
  0x23   :  { %34 = dma.hbm_to_vmem [thread:$0]  %s383_s1, 1024, %s29_s27, [#allocation6], %s312_s0, %s312_s0, %s313_s9  }
  0x24   :  { %302 = dma.done.wait [#allocation3], 256  }
  0x25   :  { %303 = vsyncadd [#allocation3], 4294967040 }
  0x26   :  { %304 = dma.done.wait [#allocation6], 1024  }
  0x27   :  { %305 = vsyncadd [#allocation6], 4294966272  ;;  %v314_v0 = vmov 0.0   ;;  %vm315_vm0 = vmmov 0   ;;  %v228_v1 = vld [vmem:[#allocation5] sm:$0xff]   ;;  %v229_v2 = vld [vmem:[#allocation5 + $0x8] sm:$0xff]  }
  0x28   :  { %199 = vmatprep.subr.bf16.mxu0 %v314_v0  ;;  %215 = vmatprep.mubr.msk.bf16.mxu0 %vm315_vm0, %v314_v0  ;;  %v230_v3 = vld [vmem:[#allocation5 + $0x10] sm:$0xff]   ;;  %v231_v4 = vld [vmem:[#allocation5 + $0x18] sm:$0xff]   ;;  %v232_v5 = vld [vmem:[#allocation5 + $0x20] sm:$0xff]   ;;  %s316_s13 = smov [#allocation7]  }
  0x29   :  { %200 = vmatpush3.bf16.msra.mxu0 %v228_v1  ;;  %v233_v6 = vld [vmem:[#allocation5 + $0x28] sm:$0xff]   ;;  %v234_v7 = vld [vmem:[#allocation5 + $0x30] sm:$0xff]   ;;  %v235_v8 = vld [vmem:[#allocation5 + $0x38] sm:$0xff]   ;;  %s168_s14 = sshll.u32 %s316_s13, 4  ;;  %s169_s14 = int_to_ptr.vmem [resolvable:$true] %s168_s14 }
  0x2a   :  { %201 = vmatprep.subr.bf16.mxu0 %v314_v0  ;;  %v44_v9 = vld [vmem:[#allocation2] sm:$0xff]  ;;  %v45_v10 = vld [vmem:[#allocation2 + $0x8] sm:$0xff]  ;;  %s280_s15 = scalar_lea.vmem %s169_s14, 256  ;;  %p285_p3 = scmp.lt.s32.totalorder %s169_s14, %s169_s14 }
  0x2b   :  { %v46_v11 = vpack.c.bf16 %v45_v10, %v44_v9  ;;  %v181_v12 = vld [vmem:[%s384_s2] ss:$0 sm:$0xff]  ;;  %p281_p2 = scmp.ne.s32.totalorder %s169_s14, %s280_s15  ;;  %p286_p4 = scmp.lt.s32.totalorder %s280_s15, %s280_s15 }
  0x2d   :  { %202 = vmatpush3.bf16.msra.mxu0 %v229_v2  ;;  %p287_p5 = por %p286_p4, %p285_p3 }
  0x2e   :  { %203 = vmatprep.subr.bf16.mxu0 %v314_v0 }
  0x2f   :  { %p288_p6 = pnand %p287_p5, %p281_p2 }
  0x31   :  { %204 = vmatpush3.bf16.msra.mxu0 %v230_v3 }
  0x32   :  { %205 = vmatprep.subr.bf16.mxu0 %v314_v0 }
  0x35   :  { %206 = vmatpush3.bf16.msra.mxu0 %v231_v4 }
  0x36   :  { %207 = vmatprep.subr.bf16.mxu0 %v314_v0 }
  0x39   :  { %208 = vmatpush3.bf16.msra.mxu0 %v232_v5 }
  0x3a   :  { %209 = vmatprep.subr.bf16.mxu0 %v314_v0 }
  0x3d   :  { %210 = vmatpush3.bf16.msra.mxu0 %v233_v6 }
  0x3e   :  { %211 = vmatprep.subr.bf16.mxu0 %v314_v0 }
  0x41   :  { %212 = vmatpush3.bf16.msra.mxu0 %v234_v7 }
  0x42   :  { %213 = vmatprep.subr.bf16.mxu0 %v314_v0 }
  0x45   :  { %214 = vmatpush3.bf16.msra.mxu0 %v235_v8 }
  0x48   :  { %216 = vmatmul.mubr.bf16.vlgmr.msra.gmra.mrb[0].mxu0 %v46_v11 }
 0x11b   :  { %v152_v13 = vpop.f32.mrb[0].mxu0 }
 0x11c   :  { %v153_v14 = vadd.f32 %v181_v12, %v152_v13  ;;  %v217_v15 = vpop.f32.mrb[1].mxu0 }
 0x11d   :  { %v155_v16 = vpop.f32.mrb[2].mxu0 }
 0x11e   :  { %v159_v17 = vmax.f32 %v153_v14, 0.0  ;;  %v156_v18 = vadd.f32 %v181_v12, %v155_v16  ;;  %v218_v19 = vpop.f32.mrb[3].mxu0 }
 0x120   :  { %161 = vst [vmem:[#allocation7] sm:$0xff] %v159_v17  ;;  %v160_v20 = vmax.f32 %v156_v18, 0.0 }
 0x122   :  { %162 = vst [vmem:[#allocation7 + $0x8] sm:$0xff] %v160_v20 }
 0x123   :  { %291 = shalt.err (!%p288_p6)
}
 0x124   :  { %s292_s17 = scalar_lea.hbm %s385_s3, 256 }
 0x125   :  { %p293_p7 = scmp.ne.s32.totalorder %s385_s3, %s292_s17  ;;  %p296_p8 = scmp.lt.u32.totalorder %s292_s17, %s385_s3 }
 0x127   :  { %p298_p9 = pnand %p296_p8, %p293_p7 }
 0x129   :  { %301 = shalt.err (!%p298_p9)
}
 0x12a   :  { %174 = dma.vmem_to_hbm [thread:$0]  %s169_s14, 256, %s385_s3, [#allocation4], %s309_s22, %s309_s22, %s310_s23  }
 0x12b   :  { %306 = dma.done.wait [#allocation4], 256  }
 0x12c   :  { %307 = vsyncadd [#allocation4], 4294967040 }
 0x12d   :  { %178 = vsyncpa [#allocation3], 1 }
 0x12e   :  { %179 = vsyncpa [#allocation6], 1 }
 0x12f   :  { %180 = vsyncpa [#allocation4], 1 }

</bundles_post_ra>
